<compile_context>
chip_gen: v5e
topology: v5e:2x2
jax: 0.10.0
libtpu: 0.0.40
codegen_flags: <defaults>
</compile_context>

<pallas_src>
import functools

import jax
import jax.numpy as jnp
from jax.experimental import pallas as pl
from jax.experimental.pallas import tpu as pltpu

_EPS = 1e-6  # matches torch.nn.functional.pairwise_distance default eps


# ----------------------------------------------------------------------------
# Kernels
# ----------------------------------------------------------------------------
def _contrastive_kernel(margin, batch, x1_ref, x2_ref, label_ref, out_ref):
    """Row-streaming path (arbitrary D).

    x1_ref, x2_ref : (TB, D)     embeddings (upcast to f32 in-kernel)
    label_ref      : (TB, 1)     binary labels
    out_ref        : (1, 8, 128) f32, broadcast-filled with this tile's partial
    """
    tile = pl.program_id(0)
    tb = label_ref.shape[0]

    diff = x1_ref[...].astype(jnp.float32) - x2_ref[...].astype(jnp.float32) + _EPS
    d2 = jnp.sum(diff * diff, axis=-1, keepdims=True)          # (TB, 1)
    lab = label_ref[...].astype(jnp.float32)

    hinge = jnp.maximum(margin - jnp.sqrt(d2), 0.0)
    loss = (1.0 - lab) * d2 + lab * (hinge * hinge)             # (TB, 1)

    # Ragged last tile: select (not multiply) so garbage rows can't make NaN.
    rows = tile * tb + jax.lax.broadcasted_iota(jnp.int32, (tb, 1), 0)
    partial = jnp.sum(jnp.where(rows < batch, loss, 0.0))

    # Lane-dense (8,128) block store: one unmasked vreg store per tile.
    out_ref[...] = jnp.broadcast_to(partial, out_ref.shape)


def _contrastive_packed_kernel(margin, batch, pack, feat,
                               x1_ref, x2_ref, label_ref, out_ref):
    """Lane-packed path for small D (128 % D == 0, D < 128).

    x1_ref, x2_ref : (TBP, 128)   = `pack` logical rows of D features per row
    label_ref      : (TBP, pack)  binary labels, one per logical row
    out_ref        : (1, 8, 128)  f32 partial-sum block
    """
    tile = pl.program_id(0)
    tbp = label_ref.shape[0]

    diff = x1_ref[...].astype(jnp.float32) - x2_ref[...].astype(jnp.float32) + _EPS
    sq = diff * diff                                            # (TBP, 128)
    lab = label_ref[...].astype(jnp.float32)                    # (TBP, pack)

    # Global logical-row base index for each packed row of this tile.
    row_base = (tile * tbp
                + jax.lax.broadcasted_iota(jnp.int32, (tbp, 1), 0)) * pack

    # Short unrolled segmented reduce: exact f32 per-row sums, no matmul needed.
    partial = jnp.float32(0.0)
    for s in range(pack):
        d2_s = jnp.sum(sq[:, s * feat:(s + 1) * feat], axis=-1, keepdims=True)
        lab_s = lab[:, s:s + 1]
        hinge = jnp.maximum(margin - jnp.sqrt(d2_s), 0.0)
        loss_s = (1.0 - lab_s) * d2_s + lab_s * (hinge * hinge)
        valid = (row_base + s) < batch
        partial = partial + jnp.sum(jnp.where(valid, loss_s, 0.0))

    out_ref[...] = jnp.broadcast_to(partial, out_ref.shape)


# ----------------------------------------------------------------------------
# Tiling / VMEM budgeting
# ----------------------------------------------------------------------------
def _round_up(x, m):
    return ((x + m - 1) // m) * m


def _vmem_limit_bytes():
    """Scoped-VMEM limit per generation: ~64 MiB on 128-MiB parts (v5e/v6e),
    ~48 MiB on 64-MiB parts (v7x)."""
    try:
        cap = pltpu.get_tpu_info().vmem_capacity_bytes
    except Exception:  # non-TPU / interpret fallback
        cap = 64 * 1024 * 1024
    return int(min((cap * 3) // 4, 64 * 1024 * 1024))


def _pick_tile(n_rows, row_bytes, requested_rows):
    """Largest sublane-aligned row tile whose 2 inputs x 2 pipeline buffers fit
    ~3/4 of the scoped-VMEM limit (rest left for label/output buffers and
    compiler scratch)."""
    if requested_rows is not None:
        rows = int(requested_rows)
    else:
        per_buffer = (_vmem_limit_bytes() * 3 // 4) // 4
        # TODO(synk): add a D-chunked accumulation path for extremely wide
        # embeddings where even 8 rows exceed per_buffer.
        rows = max(8, per_buffer // max(row_bytes, 1))
    if rows >= n_rows:
        return n_rows            # block == full array dim: always layout-legal
    return max(8, (rows // 8) * 8)


# ----------------------------------------------------------------------------
# Wrapper
# ----------------------------------------------------------------------------
def contrastive_loss(output1, output2, label, *, margin, block_rows=None):
    """Pallas TPU implementation of ContrastiveLoss.forward.

    output1, output2 : (B, D) float32 or bfloat16
    label            : (B, 1) or (B,) float
    returns          : scalar float32 loss
    """
    assert output1.shape == output2.shape and output1.ndim == 2
    B, D = output1.shape
    label = jnp.reshape(label, (B,)).astype(jnp.float32)

    itemsize = jnp.dtype(output1.dtype).itemsize
    pack = 128 // D if (D < 128 and 128 % D == 0) else 1
    packable = pack > 1 and pack <= 16 and (B % pack == 0)

    if packable:
        # Lane-dense repack: (B, D) -> (B/pack, 128). Free row-major reshape.
        bp = B // pack
        x1 = output1.reshape(bp, 128)
        x2 = output2.reshape(bp, 128)
        lab = label.reshape(bp, pack)
        row_bytes = 128 * itemsize
        req = None if block_rows is None else max(1, int(block_rows) // pack)
        tb = _pick_tile(bp, row_bytes, req)
        nt = pl.cdiv(bp, tb)
        kernel = functools.partial(_contrastive_packed_kernel,
                                   float(margin), B, pack, D)
        in_specs = [
            pl.BlockSpec((tb, 128), lambda i: (i, 0)),
            pl.BlockSpec((tb, 128), lambda i: (i, 0)),
            pl.BlockSpec((tb, pack), lambda i: (i, 0)),
        ]
    else:
        x1, x2, lab = output1, output2, label[:, None]
        row_bytes = _round_up(D, 128) * itemsize   # minor dim pads to 128 lanes
        tb = _pick_tile(B, row_bytes, block_rows)
        nt = pl.cdiv(B, tb)
        kernel = functools.partial(_contrastive_kernel, float(margin), B)
        in_specs = [
            pl.BlockSpec((tb, D), lambda i: (i, 0)),
            pl.BlockSpec((tb, D), lambda i: (i, 0)),
            pl.BlockSpec((tb, 1), lambda i: (i, 0)),
        ]

    cost = pl.CostEstimate(
        flops=6 * B * D + 10 * B,
        transcendentals=B,  # one sqrt per row
        bytes_accessed=2 * B * D * itemsize + B * 4 + nt * 8 * 128 * 4,
    )

    # TODO(synk): confirm in an xprof trace that both v7x TensorCores pick up
    # tiles with "parallel"; if not, switch this axis to pltpu.CORE_PARALLEL.
    partials = pl.pallas_call(
        kernel,
        out_shape=jax.ShapeDtypeStruct((nt, 8, 128), jnp.float32),
        grid=(nt,),
        in_specs=in_specs,
        out_specs=pl.BlockSpec((1, 8, 128), lambda i: (i, 0, 0)),
        compiler_params=pltpu.CompilerParams(
            dimension_semantics=("parallel",),
            vmem_limit_bytes=_vmem_limit_bytes(),
        ),
        cost_estimate=cost,
    )(x1, x2, lab)

    # Tiny epilogue: sum per-tile partials and divide by the true batch size.
    return jnp.sum(partials[:, 0, 0]) / jnp.float32(B)


# ----------------------------------------------------------------------------
# Reference + self-test
# ----------------------------------------------------------------------------
def _reference(output1, output2, label, *, margin):
    d = jnp.sqrt(jnp.sum(jnp.square(output1 - output2 + _EPS),
                         axis=-1, keepdims=True))
    label = jnp.reshape(label, (-1, 1))
    return jnp.mean((1.0 - label) * jnp.square(d)
                    + label * jnp.square(jnp.maximum(margin - d, 0.0)))


if __name__ == "__main__":
    key = jax.random.PRNGKey(0)
    keys = jax.random.split(key, 9)
    margin = 2.0

    # Case 1: small-D f32 -> lane-packed path (pack=4), single tile.
    B, D = 8, 32
    x1 = jax.random.normal(keys[0], (B, D), dtype=jnp.float32)
    x2 = jax.random.normal(keys[1], (B, D), dtype=jnp.float32)
    lab = jax.random.bernoulli(keys[2], p=0.5, shape=(B, 1)).astype(jnp.float32)
    loss = contrastive_loss(x1, x2, lab, margin=margin)
    jax.block_until_ready(loss)
    ref = _reference(x1, x2, lab, margin=margin)
    assert jnp.allclose(loss, ref, rtol=1e-5, atol=1e-5), (loss, ref)

    # Case 2: bf16, lane-packed, multi-tile grid with ragged last tile, no pad.
    B2, D2 = 40, 32
    x1b = jax.random.normal(keys[3], (B2, D2), dtype=jnp.float32).astype(jnp.bfloat16)
    x2b = jax.random.normal(keys[4], (B2, D2), dtype=jnp.float32).astype(jnp.bfloat16)
    lab2 = jax.random.bernoulli(keys[5], p=0.5, shape=(B2, 1)).astype(jnp.float32)
    loss2 = contrastive_loss(x1b, x2b, lab2, margin=margin, block_rows=32)
    jax.block_until_ready(loss2)
    ref2 = _reference(x1b.astype(jnp.float32), x2b.astype(jnp.float32), lab2,
                      margin=margin)
    assert jnp.allclose(loss2, ref2, rtol=1e-4, atol=1e-4), (loss2, ref2)

    # Case 3: D not lane-packable -> row-streaming path, multi-tile ragged grid.
    B3, D3 = 20, 200
    x1c = jax.random.normal(keys[6], (B3, D3), dtype=jnp.float32)
    x2c = jax.random.normal(keys[7], (B3, D3), dtype=jnp.float32)
    lab3 = jax.random.bernoulli(keys[8], p=0.5, shape=(B3, 1)).astype(jnp.float32)
    loss3 = contrastive_loss(x1c, x2c, lab3, margin=margin, block_rows=8)
    jax.block_until_ready(loss3)
    ref3 = _reference(x1c, x2c, lab3, margin=margin)
    assert jnp.allclose(loss3, ref3, rtol=1e-5, atol=1e-5), (loss3, ref3)

    print("KERNEL_OK")
</pallas_src>

<mosaic_0001>
module attributes {stable_mosaic.version = 11 : i64} {
  func.func @_contrastive_packed_kernel(%arg0: i32, %arg1: memref<2x128xf32, #tpu.memory_space<vmem>>, %arg2: memref<2x128xf32, #tpu.memory_space<vmem>>, %arg3: memref<2x4xf32, #tpu.memory_space<vmem>>, %arg4: memref<1x8x128xf32, #tpu.memory_space<vmem>>) attributes {dimension_semantics = [#tpu.dimension_semantics<parallel>], iteration_bounds = array<i64: 1>, scalar_prefetch = 0 : i64, scratch_operands = 0 : i64, tpu.core_type = #tpu.core_type<tc>, window_params = [{transform_indices = @transform_0, window_bounds = array<i64: 2, 128>}, {transform_indices = @transform_1, window_bounds = array<i64: 2, 128>}, {transform_indices = @transform_2, window_bounds = array<i64: 2, 4>}, {transform_indices = @transform_3, window_bounds = array<i64: 1, 8, 128>}]} {
    %c0 = arith.constant 0 : index
    %c0_0 = arith.constant 0 : index
    %0 = vector.load %arg1[%c0, %c0_0] : memref<2x128xf32, #tpu.memory_space<vmem>>, vector<2x128xf32>
    %c0_1 = arith.constant 0 : index
    %c0_2 = arith.constant 0 : index
    %1 = vector.load %arg2[%c0_1, %c0_2] : memref<2x128xf32, #tpu.memory_space<vmem>>, vector<2x128xf32>
    %2 = arith.subf %0, %1 : vector<2x128xf32>
    %cst = arith.constant 9.99999997E-7 : f32
    %3 = vector.broadcast %cst : f32 to vector<2x128xf32>
    %4 = arith.addf %2, %3 : vector<2x128xf32>
    %5 = arith.mulf %4, %4 : vector<2x128xf32>
    %c0_3 = arith.constant 0 : index
    %c0_4 = arith.constant 0 : index
    %6 = vector.load %arg3[%c0_3, %c0_4] : memref<2x4xf32, #tpu.memory_space<vmem>>, vector<2x4xf32>
    %c2_i32 = arith.constant 2 : i32
    %7 = arith.muli %arg0, %c2_i32 : i32
    %8 = tpu.iota {dimensions = array<i32: 0>} : vector<2x1xi32>
    %9 = vector.broadcast %7 : i32 to vector<2x1xi32>
    %10 = arith.addi %9, %8 : vector<2x1xi32>
    %c4_i32 = arith.constant 4 : i32
    %11 = vector.broadcast %c4_i32 : i32 to vector<2x1xi32>
    %12 = arith.muli %10, %11 : vector<2x1xi32>
    %13 = vector.extract_strided_slice %5 {offsets = [0, 0], sizes = [2, 32], strides = [1, 1]} : vector<2x128xf32> to vector<2x32xf32>
    %cst_5 = arith.constant dense<0.000000e+00> : vector<2xf32>
    %14 = vector.multi_reduction <add>, %13, %cst_5 [1] : vector<2x32xf32> to vector<2xf32>
    %15 = vector.shape_cast %14 : vector<2xf32> to vector<2x1xf32>
    %16 = vector.extract_strided_slice %6 {offsets = [0, 0], sizes = [2, 1], strides = [1, 1]} : vector<2x4xf32> to vector<2x1xf32>
    %17 = math.sqrt %15 : vector<2x1xf32>
    %cst_6 = arith.constant 2.000000e+00 : f32
    %18 = vector.broadcast %cst_6 : f32 to vector<2x1xf32>
    %19 = arith.subf %18, %17 : vector<2x1xf32>
    %cst_7 = arith.constant 0.000000e+00 : f32
    %20 = vector.broadcast %cst_7 : f32 to vector<2x1xf32>
    %21 = arith.maximumf %19, %20 : vector<2x1xf32>
    %cst_8 = arith.constant 1.000000e+00 : f32
    %22 = vector.broadcast %cst_8 : f32 to vector<2x1xf32>
    %23 = arith.subf %22, %16 : vector<2x1xf32>
    %24 = arith.mulf %23, %15 : vector<2x1xf32>
    %25 = arith.mulf %21, %21 : vector<2x1xf32>
    %26 = arith.mulf %16, %25 : vector<2x1xf32>
    %27 = arith.addf %24, %26 : vector<2x1xf32>
    %c0_i32 = arith.constant 0 : i32
    %28 = vector.broadcast %c0_i32 : i32 to vector<2x1xi32>
    %29 = arith.addi %12, %28 : vector<2x1xi32>
    %c8_i32 = arith.constant 8 : i32
    %30 = vector.broadcast %c8_i32 : i32 to vector<2x1xi32>
    %31 = arith.cmpi slt, %29, %30 : vector<2x1xi32>
    %cst_9 = arith.constant 0.000000e+00 : f32
    %32 = vector.broadcast %cst_9 : f32 to vector<2x1xf32>
    %33 = arith.select %31, %27, %32 : vector<2x1xi1>, vector<2x1xf32>
    %34 = vector.shape_cast %33 : vector<2x1xf32> to vector<1x2x1xf32>
    %cst_10 = arith.constant dense<0.000000e+00> : vector<1xf32>
    %35 = vector.multi_reduction <add>, %34, %cst_10 [1, 2] : vector<1x2x1xf32> to vector<1xf32>
    %36 = vector.shape_cast %35 : vector<1xf32> to vector<1x1x1xf32>
    %37 = vector.extract %36[0, 0, 0] : f32 from vector<1x1x1xf32>
    %cst_11 = arith.constant 0.000000e+00 : f32
    %38 = arith.addf %cst_11, %37 : f32
    %39 = vector.extract_strided_slice %5 {offsets = [0, 32], sizes = [2, 32], strides = [1, 1]} : vector<2x128xf32> to vector<2x32xf32>
    %cst_12 = arith.constant dense<0.000000e+00> : vector<2xf32>
    %40 = vector.multi_reduction <add>, %39, %cst_12 [1] : vector<2x32xf32> to vector<2xf32>
    %41 = vector.shape_cast %40 : vector<2xf32> to vector<2x1xf32>
    %42 = vector.extract_strided_slice %6 {offsets = [0, 1], sizes = [2, 1], strides = [1, 1]} : vector<2x4xf32> to vector<2x1xf32>
    %43 = math.sqrt %41 : vector<2x1xf32>
    %cst_13 = arith.constant 2.000000e+00 : f32
    %44 = vector.broadcast %cst_13 : f32 to vector<2x1xf32>
    %45 = arith.subf %44, %43 : vector<2x1xf32>
    %cst_14 = arith.constant 0.000000e+00 : f32
    %46 = vector.broadcast %cst_14 : f32 to vector<2x1xf32>
    %47 = arith.maximumf %45, %46 : vector<2x1xf32>
    %cst_15 = arith.constant 1.000000e+00 : f32
    %48 = vector.broadcast %cst_15 : f32 to vector<2x1xf32>
    %49 = arith.subf %48, %42 : vector<2x1xf32>
    %50 = arith.mulf %49, %41 : vector<2x1xf32>
    %51 = arith.mulf %47, %47 : vector<2x1xf32>
    %52 = arith.mulf %42, %51 : vector<2x1xf32>
    %53 = arith.addf %50, %52 : vector<2x1xf32>
    %c1_i32 = arith.constant 1 : i32
    %54 = vector.broadcast %c1_i32 : i32 to vector<2x1xi32>
    %55 = arith.addi %12, %54 : vector<2x1xi32>
    %c8_i32_16 = arith.constant 8 : i32
    %56 = vector.broadcast %c8_i32_16 : i32 to vector<2x1xi32>
    %57 = arith.cmpi slt, %55, %56 : vector<2x1xi32>
    %cst_17 = arith.constant 0.000000e+00 : f32
    %58 = vector.broadcast %cst_17 : f32 to vector<2x1xf32>
    %59 = arith.select %57, %53, %58 : vector<2x1xi1>, vector<2x1xf32>
    %60 = vector.shape_cast %59 : vector<2x1xf32> to vector<1x2x1xf32>
    %cst_18 = arith.constant dense<0.000000e+00> : vector<1xf32>
    %61 = vector.multi_reduction <add>, %60, %cst_18 [1, 2] : vector<1x2x1xf32> to vector<1xf32>
    %62 = vector.shape_cast %61 : vector<1xf32> to vector<1x1x1xf32>
    %63 = vector.extract %62[0, 0, 0] : f32 from vector<1x1x1xf32>
    %64 = arith.addf %38, %63 : f32
    %65 = vector.extract_strided_slice %5 {offsets = [0, 64], sizes = [2, 32], strides = [1, 1]} : vector<2x128xf32> to vector<2x32xf32>
    %cst_19 = arith.constant dense<0.000000e+00> : vector<2xf32>
    %66 = vector.multi_reduction <add>, %65, %cst_19 [1] : vector<2x32xf32> to vector<2xf32>
    %67 = vector.shape_cast %66 : vector<2xf32> to vector<2x1xf32>
    %68 = vector.extract_strided_slice %6 {offsets = [0, 2], sizes = [2, 1], strides = [1, 1]} : vector<2x4xf32> to vector<2x1xf32>
    %69 = math.sqrt %67 : vector<2x1xf32>
    %cst_20 = arith.constant 2.000000e+00 : f32
    %70 = vector.broadcast %cst_20 : f32 to vector<2x1xf32>
    %71 = arith.subf %70, %69 : vector<2x1xf32>
    %cst_21 = arith.constant 0.000000e+00 : f32
    %72 = vector.broadcast %cst_21 : f32 to vector<2x1xf32>
    %73 = arith.maximumf %71, %72 : vector<2x1xf32>
    %cst_22 = arith.constant 1.000000e+00 : f32
    %74 = vector.broadcast %cst_22 : f32 to vector<2x1xf32>
    %75 = arith.subf %74, %68 : vector<2x1xf32>
    %76 = arith.mulf %75, %67 : vector<2x1xf32>
    %77 = arith.mulf %73, %73 : vector<2x1xf32>
    %78 = arith.mulf %68, %77 : vector<2x1xf32>
    %79 = arith.addf %76, %78 : vector<2x1xf32>
    %c2_i32_23 = arith.constant 2 : i32
    %80 = vector.broadcast %c2_i32_23 : i32 to vector<2x1xi32>
    %81 = arith.addi %12, %80 : vector<2x1xi32>
    %c8_i32_24 = arith.constant 8 : i32
    %82 = vector.broadcast %c8_i32_24 : i32 to vector<2x1xi32>
    %83 = arith.cmpi slt, %81, %82 : vector<2x1xi32>
    %cst_25 = arith.constant 0.000000e+00 : f32
    %84 = vector.broadcast %cst_25 : f32 to vector<2x1xf32>
    %85 = arith.select %83, %79, %84 : vector<2x1xi1>, vector<2x1xf32>
    %86 = vector.shape_cast %85 : vector<2x1xf32> to vector<1x2x1xf32>
    %cst_26 = arith.constant dense<0.000000e+00> : vector<1xf32>
    %87 = vector.multi_reduction <add>, %86, %cst_26 [1, 2] : vector<1x2x1xf32> to vector<1xf32>
    %88 = vector.shape_cast %87 : vector<1xf32> to vector<1x1x1xf32>
    %89 = vector.extract %88[0, 0, 0] : f32 from vector<1x1x1xf32>
    %90 = arith.addf %64, %89 : f32
    %91 = vector.extract_strided_slice %5 {offsets = [0, 96], sizes = [2, 32], strides = [1, 1]} : vector<2x128xf32> to vector<2x32xf32>
    %cst_27 = arith.constant dense<0.000000e+00> : vector<2xf32>
    %92 = vector.multi_reduction <add>, %91, %cst_27 [1] : vector<2x32xf32> to vector<2xf32>
    %93 = vector.shape_cast %92 : vector<2xf32> to vector<2x1xf32>
    %94 = vector.extract_strided_slice %6 {offsets = [0, 3], sizes = [2, 1], strides = [1, 1]} : vector<2x4xf32> to vector<2x1xf32>
    %95 = math.sqrt %93 : vector<2x1xf32>
    %cst_28 = arith.constant 2.000000e+00 : f32
    %96 = vector.broadcast %cst_28 : f32 to vector<2x1xf32>
    %97 = arith.subf %96, %95 : vector<2x1xf32>
    %cst_29 = arith.constant 0.000000e+00 : f32
    %98 = vector.broadcast %cst_29 : f32 to vector<2x1xf32>
    %99 = arith.maximumf %97, %98 : vector<2x1xf32>
    %cst_30 = arith.constant 1.000000e+00 : f32
    %100 = vector.broadcast %cst_30 : f32 to vector<2x1xf32>
    %101 = arith.subf %100, %94 : vector<2x1xf32>
    %102 = arith.mulf %101, %93 : vector<2x1xf32>
    %103 = arith.mulf %99, %99 : vector<2x1xf32>
    %104 = arith.mulf %94, %103 : vector<2x1xf32>
    %105 = arith.addf %102, %104 : vector<2x1xf32>
    %c3_i32 = arith.constant 3 : i32
    %106 = vector.broadcast %c3_i32 : i32 to vector<2x1xi32>
    %107 = arith.addi %12, %106 : vector<2x1xi32>
    %c8_i32_31 = arith.constant 8 : i32
    %108 = vector.broadcast %c8_i32_31 : i32 to vector<2x1xi32>
    %109 = arith.cmpi slt, %107, %108 : vector<2x1xi32>
    %cst_32 = arith.constant 0.000000e+00 : f32
    %110 = vector.broadcast %cst_32 : f32 to vector<2x1xf32>
    %111 = arith.select %109, %105, %110 : vector<2x1xi1>, vector<2x1xf32>
    %112 = vector.shape_cast %111 : vector<2x1xf32> to vector<1x2x1xf32>
    %cst_33 = arith.constant dense<0.000000e+00> : vector<1xf32>
    %113 = vector.multi_reduction <add>, %112, %cst_33 [1, 2] : vector<1x2x1xf32> to vector<1xf32>
    %114 = vector.shape_cast %113 : vector<1xf32> to vector<1x1x1xf32>
    %115 = vector.extract %114[0, 0, 0] : f32 from vector<1x1x1xf32>
    %116 = arith.addf %90, %115 : f32
    %117 = vector.broadcast %116 : f32 to vector<1x8x128xf32>
    %c0_34 = arith.constant 0 : index
    %c0_35 = arith.constant 0 : index
    %c0_36 = arith.constant 0 : index
    %118 = vector.load %arg4[%c0_34, %c0_35, %c0_36] : memref<1x8x128xf32, #tpu.memory_space<vmem>>, vector<1x8x128xf32>
    tpu.vector_store %arg4[%c0_34, %c0_35, %c0_36], %117 {strides = array<i32>} : memref<1x8x128xf32, #tpu.memory_space<vmem>>, vector<1x8x128xf32>,
    return
  }
  func.func @transform_0(%arg0: i32) -> (i32, i32) {
    %c0_i32 = arith.constant 0 : i32
    %c0_i32_0 = arith.constant 0 : i32
    return %arg0, %c0_i32 : i32, i32
  }
  func.func @transform_1(%arg0: i32) -> (i32, i32) {
    %c0_i32 = arith.constant 0 : i32
    %c0_i32_0 = arith.constant 0 : i32
    return %arg0, %c0_i32 : i32, i32
  }
  func.func @transform_2(%arg0: i32) -> (i32, i32) {
    %c0_i32 = arith.constant 0 : i32
    %c0_i32_0 = arith.constant 0 : i32
    return %arg0, %c0_i32 : i32, i32
  }
  func.func @transform_3(%arg0: i32) -> (i32, i32, i32) {
    %c0_i32 = arith.constant 0 : i32
    %c0_i32_0 = arith.constant 0 : i32
    %c0_i32_1 = arith.constant 0 : i32
    return %arg0, %c0_i32, %c0_i32_0 : i32, i32, i32
  }
}

</mosaic_0001>

<bundles_post_ra>
// kernel: tpu_custom_call.1
= control target key start
LH: loop header
LB: loop body
LE: loop exit
PB: predicated region body
PF: predicated region fallthrough
CT: control target
= control target key end

     0   :  { %8 = vsyncpa [#allocation3], 0  ;;  %s465_s0 = inlined_call_operand.hbm [shape: f32[2,128], index: 0, kind: input, shape index: {}]   ;;  %s466_s1 = inlined_call_operand.hbm [shape: f32[2,128], index: 1, kind: input, shape index: {}]   ;;  %s467_s2 = inlined_call_operand.hbm [shape: f32[2,4], index: 2, kind: input, shape index: {}]   ;;  %s468_s3 = inlined_call_operand.hbm [shape: f32[1,8,128], index: 3, kind: output, shape index: {}]  }
   0x1   :  { %9 = vsyncpa [#allocation6], 0  ;;  %s27_s14 = sshll.u32 %s466_s1, 4  ;;  %s28_s14 = int_to_ptr.hbm [resolvable:$true] %s27_s14 }
   0x2   :  { %10 = vsyncpa [#allocation4], 0  ;;  %s380_s15 = smov [#allocation5]   ;;  %s16_s19 = sshll.u32 %s465_s0, 4  ;;  %s17_s19 = int_to_ptr.hbm [resolvable:$true] %s16_s19 }
   0x3   :  { %s29_s16 = sshll.u32 %s380_s15, 4  ;;  %s381_s20 = smov [#allocation2]   ;;  %s30_s16 = int_to_ptr.vmem [resolvable:$true] %s29_s16 }
   0x4   :  { %32 = dma.hbm_to_vmem [thread:$0]  %s28_s14, 32, %s30_s16, [#allocation6]  }
   0x5   :  { %s18_s21 = sshll.u32 %s381_s20, 4  ;;  %s38_s24 = sshll.u32 %s467_s2, 4  ;;  %s19_s21 = int_to_ptr.vmem [resolvable:$true] %s18_s21  ;;  %s39_s24 = int_to_ptr.hbm [resolvable:$true] %s38_s24 }
   0x6   :  { %21 = dma.hbm_to_vmem [thread:$0]  %s17_s19, 32, %s19_s21, [#allocation3]  }
   0x7   :  { %s382_s1 = smov [#allocation7]  }
   0x8   :  { %s40_s25 = sshll.u32 %s382_s1, 4  ;;  %s41_s25 = int_to_ptr.vmem [resolvable:$true] %s40_s25 }
   0x9   :  { %43 = dma.hbm_to_vmem [thread:$0]  %s39_s24, 32, %s41_s25, [#allocation6]  }
   0xa   :  { %374 = dma.done.wait [#allocation3], 32  }
   0xb   :  { %375 = vsyncadd [#allocation3], 4294967264 }
   0xc   :  { %376 = dma.done.wait [#allocation6], 64  }
   0xd   :  { %377 = vsyncadd [#allocation6], 4294967232  ;;  %v56_v0 = vld [vmem:[#allocation2] sm:$0x3]  ;;  %v57_v1 = vld [vmem:[#allocation5] sm:$0x3]  ;;  %v63_v18 = vlaneseq }
   0xe   :  { %v58_v2 = vsub.f32 %v56_v0, %v57_v1  ;;  %s383_s0 = smov 96   ;;  %s384_s26 = smov 32   ;;  %vm68_vm0 = vcmask 254976   ;;  %v429_v29 = vld [vmem:[#allocation7] sm:$0x3]  ;;  %vm93_vm13 = vcmask 1024  }
   0xf   :  { %s385_s2 = smov 64   ;;  %v64_v24 = vshrl.u32 %v63_v18, 7  ;;  %v86_v37 = vsub.f32 1.0, %v429_v29  ;;  %s386_s27 = smov 127  }
  0x10   :  { %v59_v3 = vadd.f32 1e-06, %v58_v2  ;;  %s387_s28 = smov 126   ;;  %s388_s29 = smov 125  }
  0x11   :  { %v431_v32 = vmul.u32 4, %v64_v24  ;;  %s389_s7 = smov [#allocation8]   ;;  %s241_s12 = sshll.u32 %s468_s3, 4  ;;  %s242_s12 = int_to_ptr.hbm [resolvable:$true] %s241_s12 }
  0x12   :  { %v60_v4 = vmul.f32 %v59_v3, %v59_v3  ;;  %s239_s8 = sshll.u32 %s389_s7, 4  ;;  %s240_s8 = int_to_ptr.vmem [resolvable:$true] %s239_s8 }
  0x13   :  { %v130_v42 = vadd.s32 1, %v431_v32  ;;  %v172_v62 = vadd.s32 2, %v431_v32  ;;  %vm91_vm12 = vcmp.lt.s32.totalorder %v431_v32, 8 }
  0x14   :  { %106 = vrot.lane.b32.xlu0 %v60_v4, %s383_s0  ;;  %190 = vrot.lane.b32.xlu1 %v60_v4, %s384_s26  ;;  %v69_v5 = vsel %vm68_vm0, %v60_v4, 0.0 }
  0x15   :  { %vm131_vm5 = vcmp.lt.s32.totalorder %v130_v42, 8  ;;  %vm173_vm10 = vcmp.lt.s32.totalorder %v172_v62, 8 }
  0x1c   :  { %148 = vrot.lane.b32.xlu0 %v60_v4, %s385_s2 }
  0x46   :  { %70 = vadd.xlane.f32.xlu0 %v69_v5 }
  0x86   :  { %v107_v6 = vpop.permute.xlu0 %106  ;;  %v191_v10 = vpop.permute.xlu1 %190 }
  0x87   :  { %v109_v7 = vsel %vm68_vm0, %v107_v6, 0.0  ;;  %v193_v11 = vsel %vm68_vm0, %v191_v10, 0.0 }
  0x88   :  { %110 = vadd.xlane.f32.xlu1 %v109_v7 }
  0x8e   :  { %v149_v8 = vpop.permute.xlu0 %148 }
  0x8f   :  { %v151_v9 = vsel %vm68_vm0, %v149_v8, 0.0 }
  0x90   :  { %152 = vadd.xlane.f32.xlu2 %v151_v9 }
  0x98   :  { %194 = vadd.xlane.f32.xlu2 %v193_v11 }
  0xb9   :  { %v426_v25 = vpop.xlane.xlu0 %70 }
  0xba   :  { %vm79_vm6 = vcmp.eq.f32.partialorder %v426_v25, inf  ;;  %v82_v2 = vand.u32 2147483648, %v426_v25  ;;  %vm81_vm8 = vcmp.eq.f32.partialorder %v426_v25, 0.0 }
  0xfb   :  { %v111_v12 = vpop.xlane.xlu1 %110 }
  0xfc   :  { %270 = vrsqrt.f32 %v111_v12  ;;  %vm119_vm1 = vcmp.eq.f32.partialorder %v111_v12, inf  ;;  %v122_v28 = vand.u32 2147483648, %v111_v12  ;;  %vm121_vm2 = vcmp.eq.f32.partialorder %v111_v12, 0.0 }
  0xfd   :  { %v126_v47 = vmul.f32 %v111_v12, %v86_v37 }
 0x102   :  { %v271_v13 = vpop.eup %270 }
 0x103   :  { %v113_v14 = vmul.f32 %v271_v13, %v111_v12  ;;  %v419_v15 = vpop.xlane.xlu2 %152 }
 0x104   :  { %272 = vrsqrt.f32 %v419_v15  ;;  %vm161_vm3 = vcmp.eq.f32.partialorder %v419_v15, inf  ;;  %v164_v48 = vand.u32 2147483648, %v419_v15  ;;  %vm163_vm4 = vcmp.eq.f32.partialorder %v419_v15, 0.0 }
 0x105   :  { %v114_v16 = vmul.f32 %v271_v13, %v113_v14  ;;  %v168_v5 = vmul.f32 %v419_v15, %v86_v37 }
 0x107   :  { %v115_v17 = vmul.f32 0.5, %v114_v16 }
 0x109   :  { %v116_v19 = vsub.f32 1.5, %v115_v17 }
 0x10a   :  { %v273_v20 = vpop.eup %272 }
 0x10b   :  { %v155_v21 = vmul.f32 %v273_v20, %v419_v15  ;;  %v423_v22 = vpop.xlane.xlu2 %194  ;;  %v117_v23 = vmul.f32 %v271_v13, %v116_v19  ;;  %v87_v19 = vmul.f32 %v86_v37, %v426_v25 }
 0x10c   :  { %274 = vrsqrt.f32 %v423_v22  ;;  %vm203_vm7 = vcmp.eq.f32.partialorder %v423_v22, inf  ;;  %v206_v3 = vand.u32 2147483648, %v423_v22  ;;  %vm205_vm9 = vcmp.eq.f32.partialorder %v423_v22, 0.0 }
 0x10d   :  { %v118_v26 = vmul.f32 %v117_v23, %v111_v12  ;;  %v156_v27 = vmul.f32 %v273_v20, %v155_v21  ;;  %276 = vrsqrt.f32 %v426_v25  ;;  %v210_v21 = vmul.f32 %v423_v22, %v86_v37 }
 0x10f   :  { %v120_v30 = vsel %vm119_vm1, %v111_v12, %v118_v26  ;;  %v157_v31 = vmul.f32 0.5, %v156_v27 }
 0x110   :  { %v123_v33 = vsel %vm121_vm2, %v122_v28, %v120_v30 }
 0x111   :  { %v124_v34 = vsub.f32 2.0, %v123_v33  ;;  %v158_v35 = vsub.f32 1.5, %v157_v31 }
 0x112   :  { %v275_v36 = vpop.eup %274 }
 0x113   :  { %v277_v38 = vpop.eup %276  ;;  %v197_v39 = vmul.f32 %v275_v36, %v423_v22  ;;  %v125_v40 = vmax.f32 %v124_v34, 0.0  ;;  %v159_v41 = vmul.f32 %v273_v20, %v158_v35 }
 0x114   :  { %v73_v43 = vmul.f32 %v277_v38, %v426_v25 }
 0x115   :  { %v127_v44 = vmul.f32 %v125_v40, %v125_v40  ;;  %v160_v45 = vmul.f32 %v159_v41, %v419_v15  ;;  %v198_v46 = vmul.f32 %v275_v36, %v197_v39 }
 0x116   :  { %v74_v49 = vmul.f32 %v277_v38, %v73_v43 }
 0x117   :  { %v128_v50 = vmul.f32 %v127_v44, %v429_v29  ;;  %v162_v51 = vsel %vm161_vm3, %v419_v15, %v160_v45  ;;  %v199_v52 = vmul.f32 0.5, %v198_v46  ;;  %v214_v15 = vadd.s32 3, %v431_v32 }
 0x118   :  { %v165_v53 = vsel %vm163_vm4, %v164_v48, %v162_v51  ;;  %v75_v54 = vmul.f32 0.5, %v74_v49 }
 0x119   :  { %v129_v55 = vadd.f32 %v128_v50, %v126_v47  ;;  %v166_v56 = vsub.f32 2.0, %v165_v53  ;;  %v200_v57 = vsub.f32 1.5, %v199_v52  ;;  %vm215_vm11 = vcmp.lt.s32.totalorder %v214_v15, 8 }
 0x11a   :  { %v76_v58 = vsub.f32 1.5, %v75_v54 }
 0x11b   :  { %v132_v59 = vsel %vm131_vm5, %v129_v55, 0.0  ;;  %v167_v60 = vmax.f32 %v166_v56, 0.0  ;;  %v201_v61 = vmul.f32 %v275_v36, %v200_v57 }
 0x11c   :  { %134 = vrot.lane.b32.xlu2 %v132_v59, %s386_s27  ;;  %v77_v63 = vmul.f32 %v277_v38, %v76_v58 }
 0x11d   :  { %v169_v0 = vmul.f32 %v167_v60, %v167_v60  ;;  %v202_v1 = vmul.f32 %v201_v61, %v423_v22 }
 0x11e   :  { %v78_v4 = vmul.f32 %v77_v63, %v426_v25 }
 0x11f   :  { %v170_v6 = vmul.f32 %v169_v0, %v429_v29  ;;  %v204_v7 = vsel %vm203_vm7, %v423_v22, %v202_v1 }
 0x120   :  { %v207_v8 = vsel %vm205_vm9, %v206_v3, %v204_v7  ;;  %v80_v9 = vsel %vm79_vm6, %v426_v25, %v78_v4 }
 0x121   :  { %v171_v10 = vadd.f32 %v170_v6, %v168_v5  ;;  %v208_v11 = vsub.f32 2.0, %v207_v8  ;;  %v83_v12 = vsel %vm81_vm8, %v82_v2, %v80_v9 }
 0x122   :  { %v84_v13 = vsub.f32 2.0, %v83_v12 }
 0x123   :  { %v174_v14 = vsel %vm173_vm10, %v171_v10, 0.0  ;;  %v209_v16 = vmax.f32 %v208_v11, 0.0 }
 0x124   :  { %176 = vrot.lane.b32.xlu2 %v174_v14, %s387_s28  ;;  %v85_v17 = vmax.f32 %v84_v13, 0.0 }
 0x125   :  { %v211_v18 = vmul.f32 %v209_v16, %v209_v16 }
 0x126   :  { %v88_v20 = vmul.f32 %v85_v17, %v85_v17 }
 0x127   :  { %v212_v23 = vmul.f32 %v211_v18, %v429_v29 }
 0x128   :  { %v89_v24 = vmul.f32 %v88_v20, %v429_v29 }
 0x129   :  { %v213_v26 = vadd.f32 %v212_v23, %v210_v21 }
 0x12a   :  { %v90_v27 = vadd.f32 %v89_v24, %v87_v19 }
 0x12b   :  { %v216_v28 = vsel %vm215_vm11, %v213_v26, 0.0 }
 0x12c   :  { %218 = vrot.lane.b32.xlu2 %v216_v28, %s388_s29  ;;  %v92_v30 = vsel %vm91_vm12, %v90_v27, 0.0 }
 0x12d   :  { %v94_v31 = vsel %vm93_vm13, %v92_v30, 0.0 }
 0x12e   :  { %95 = vadd.xlane.f32.xlu1 %v94_v31 }
 0x176   :  { %v135_v25 = vpop.permute.xlu2 %134 }
 0x177   :  { %v137_v33 = vsel %vm93_vm13, %v135_v25, 0.0 }
 0x178   :  { %138 = vadd.xlane.f32.xlu2 %v137_v33 }
 0x17e   :  { %v177_v22 = vpop.permute.xlu2 %176 }
 0x17f   :  { %v179_v34 = vsel %vm93_vm13, %v177_v22, 0.0 }
 0x180   :  { %180 = vadd.xlane.f32.xlu0 %v179_v34 }
 0x186   :  { %v219_v35 = vpop.permute.xlu2 %218 }
 0x187   :  { %v221_v36 = vsel %vm93_vm13, %v219_v35, 0.0 }
 0x188   :  { %222 = vadd.xlane.f32.xlu1 %v221_v36 }
 0x1a1   :  { %v96_v29 = vpop.xlane.xlu1 %95 }
 0x1a2   :  { %v97_v37 = vrot.slane %v96_v29, 4 }
 0x1a4   :  { %v98_v32 = vadd.f32 %v97_v37, %v96_v29 }
 0x1a6   :  { %v99_v38 = vrot.slane %v98_v32, 2 }
 0x1a8   :  { %v100_v39 = vadd.f32 %v99_v38, %v98_v32 }
 0x1aa   :  { %v101_v40 = vrot.slane %v100_v39, 1 }
 0x1ac   :  { %v102_v41 = vadd.f32 %v101_v40, %v100_v39 }
 0x1ae   :  { %252 = vpush %v102_v41 }
 0x1df   :  { %s253_s30 = spop %252 }
 0x1eb   :  { %v139_v42 = vpop.xlane.xlu2 %138 }
 0x1ec   :  { %v140_v43 = vrot.slane %v139_v42, 4 }
 0x1ee   :  { %v141_v44 = vadd.f32 %v140_v43, %v139_v42 }
 0x1f0   :  { %v142_v45 = vrot.slane %v141_v44, 2 }
 0x1f2   :  { %v143_v46 = vadd.f32 %v142_v45, %v141_v44 }
 0x1f3   :  { %v181_v47 = vpop.xlane.xlu0 %180 }
 0x1f4   :  { %v182_v48 = vrot.slane %v181_v47, 4  ;;  %v144_v49 = vrot.slane %v143_v46, 1 }
 0x1f6   :  { %v183_v50 = vadd.f32 %v182_v48, %v181_v47  ;;  %v145_v51 = vadd.f32 %v144_v49, %v143_v46 }
 0x1f8   :  { %v184_v52 = vrot.slane %v183_v50, 2  ;;  %254 = vpush %v145_v51 }
 0x1fa   :  { %v185_v53 = vadd.f32 %v184_v52, %v183_v50 }
 0x1fb   :  { %v223_v54 = vpop.xlane.xlu1 %222 }
 0x1fc   :  { %v224_v55 = vrot.slane %v223_v54, 4  ;;  %v186_v56 = vrot.slane %v185_v53, 1 }
 0x1fe   :  { %v225_v57 = vadd.f32 %v224_v55, %v223_v54  ;;  %v187_v58 = vadd.f32 %v186_v56, %v185_v53 }
 0x200   :  { %v226_v59 = vrot.slane %v225_v57, 2  ;;  %256 = vpush %v187_v58 }
 0x202   :  { %v227_v60 = vadd.f32 %v226_v59, %v225_v57 }
 0x204   :  { %v228_v61 = vrot.slane %v227_v60, 1 }
 0x206   :  { %v229_v62 = vadd.f32 %v228_v61, %v227_v60 }
 0x208   :  { %258 = vpush %v229_v62 }
 0x229   :  { %s255_s4 = spop %254 }
 0x22a   :  { %s147_s6 = sadd.f32 %s255_s4, %s253_s30 }
 0x231   :  { %s257_s5 = spop %256 }
 0x232   :  { %s189_s9 = sadd.f32 %s257_s5, %s147_s6 }
 0x239   :  { %s259_s13 = spop %258 }
 0x23a   :  { %s231_s14 = sadd.f32 %s259_s13, %s189_s9 }
 0x23c   :  { %v232_v63 = vstv %s231_s14 }
 0x23d   :  { %233 = vst [vmem:[#allocation8] sm:$0xff] %v232_v63 }
 0x23e   :  { %244 = dma.vmem_to_hbm [thread:$0]  %s240_s8, 128, %s242_s12, [#allocation4]  }
 0x23f   :  { %378 = dma.done.wait [#allocation4], 128  }
 0x240   :  { %379 = vsyncadd [#allocation4], 4294967168 }
 0x241   :  { %249 = vsyncpa [#allocation3], 1 }
 0x242   :  { %250 = vsyncpa [#allocation6], 1 }
 0x243   :  { %251 = vsyncpa [#allocation4], 1 }

</bundles_post_ra>
